<compile_context>
chip_gen: v6e
topology: v6e:2x2x1
jax: 0.10.0
libtpu: 0.0.40
codegen_flags: <defaults>
</compile_context>

<pallas_src>
import functools

import jax
import jax.numpy as jnp
from jax import lax
from jax.experimental import pallas as pl
from jax.experimental.pallas import tpu as pltpu


def _round_up(x: int, m: int) -> int:
    return ((x + m - 1) // m) * m


# ---------------------------------------------------------------------------
# Kernels
# ---------------------------------------------------------------------------
def _tf_seq_kernel(chunk, state0_ref, gain_ref, wt_ref, obs_ref, next_ref, state_scr):
    """Teacher-forced rollout: `chunk` steps per grid step, state carried in VMEM scratch."""
    t = pl.program_id(1)                       # time-chunk axis ("arbitrary", sequential)

    @pl.when(t == 0)
    def _init():
        state_scr[...] = state0_ref[...]       # (Bt, Hp)

    gain = gain_ref[...]                       # (1, Hp): 2.0 on observed cols, 1.0 else
    wt = wt_ref[...]                           # (Hp, Hp) = A.weight.T (padded), VMEM-resident

    def step(i, state):
        # r_state = state - (obs - ConMat @ state) == (1 + mask)*state - obs_padded
        r = gain * state - obs_ref[i]          # (Bt, Hp)
        nxt = jnp.dot(jnp.tanh(r).astype(wt.dtype), wt,
                      preferred_element_type=jnp.float32)
        next_ref[i] = nxt                      # lane-dense (Bt, Hp) store
        return nxt

    state_scr[...] = lax.fori_loop(0, chunk, step, state_scr[...], unroll=True)


def _free_seq_kernel(chunk, state0_ref, wt_ref, next_ref, state_scr):
    """Free-running rollout: r_state = Ide @ state = state."""
    t = pl.program_id(1)

    @pl.when(t == 0)
    def _init():
        state_scr[...] = state0_ref[...]

    wt = wt_ref[...]

    def step(i, state):
        nxt = jnp.dot(jnp.tanh(state).astype(wt.dtype), wt,
                      preferred_element_type=jnp.float32)
        next_ref[i] = nxt
        return nxt

    state_scr[...] = lax.fori_loop(0, chunk, step, state_scr[...], unroll=True)


# ---------------------------------------------------------------------------
# Cached, jitted rollout builders (one compile per static configuration)
# ---------------------------------------------------------------------------
def _vmem_limit(hp, bt, chunk, w_itemsize):
    wt_bytes = hp * hp * w_itemsize
    pipe_bytes = 4 * chunk * bt * hp * 4              # double-buffered obs + out slabs
    return int(min(100 * 2**20, max(32 * 2**20, 2 * wt_bytes + 2 * pipe_bytes + (1 << 20))))


@functools.lru_cache(maxsize=None)
def _build_tf_rollout(n_obs, n_hid, hp, b, bp, bt, t_steps, chunk, w_dtype_name):
    w_dtype = jnp.dtype(w_dtype_name)
    t_pad = _round_up(t_steps, chunk)
    nt = t_pad // chunk
    nb = bp // bt

    kernel = functools.partial(_tf_seq_kernel, chunk)
    call = pl.pallas_call(
        kernel,
        grid=(nb, nt),
        in_specs=[
            pl.BlockSpec((bt, hp), lambda bi, ti: (bi, 0)),          # initial state (per batch tile)
            pl.BlockSpec((1, hp), lambda bi, ti: (0, 0)),            # resident gain vector
            pl.BlockSpec((hp, hp), lambda bi, ti: (0, 0),
                         pipeline_mode=pl.Buffered(1)),              # W.T resident, single-buffered
            pl.BlockSpec((chunk, bt, hp), lambda bi, ti: (ti, bi, 0)),  # observation chunk
        ],
        out_specs=pl.BlockSpec((chunk, bt, hp), lambda bi, ti: (ti, bi, 0)),
        out_shape=jax.ShapeDtypeStruct((t_pad, bp, hp), jnp.float32),
        scratch_shapes=[pltpu.VMEM((bt, hp), jnp.float32)],          # carried state
        compiler_params=pltpu.CompilerParams(
            dimension_semantics=("parallel", "arbitrary"),
            vmem_limit_bytes=_vmem_limit(hp, bt, chunk, w_dtype.itemsize)),
        cost_estimate=pl.CostEstimate(
            flops=2 * t_pad * bp * hp * hp,
            transcendentals=t_pad * bp * hp,
            bytes_accessed=hp * hp * w_dtype.itemsize + 2 * t_pad * bp * hp * 4 + bp * hp * 4),
    )

    def fn(state, obs, wt, gain):
        # state (b, n_hid) f32, obs (t_steps, b, n_obs) f32
        s0 = jnp.pad(state, ((0, bp - b), (0, hp - n_hid)))
        obs_p = jnp.pad(obs, ((0, t_pad - t_steps), (0, bp - b), (0, hp - n_obs)))
        nxt = call(s0, gain, wt, obs_p)[:t_steps, :b, :n_hid]        # (T, B, H)
        # expectation_t = ConMat @ state_t = state_t[:n_obs]; delta_t = obs_t - expectation_t
        states = jnp.concatenate([state[None], nxt[:-1]], axis=0)    # state entering step t
        exp = states[:, :, :n_obs]
        delta = obs - exp
        return exp, nxt, delta

    return jax.jit(fn)


@functools.lru_cache(maxsize=None)
def _build_free_rollout(n_obs, n_hid, hp, b, bp, bt, t_steps, chunk, w_dtype_name):
    w_dtype = jnp.dtype(w_dtype_name)
    t_pad = _round_up(t_steps, chunk)
    nt = t_pad // chunk
    nb = bp // bt

    kernel = functools.partial(_free_seq_kernel, chunk)
    call = pl.pallas_call(
        kernel,
        grid=(nb, nt),
        in_specs=[
            pl.BlockSpec((bt, hp), lambda bi, ti: (bi, 0)),
            pl.BlockSpec((hp, hp), lambda bi, ti: (0, 0),
                         pipeline_mode=pl.Buffered(1)),
        ],
        out_specs=pl.BlockSpec((chunk, bt, hp), lambda bi, ti: (ti, bi, 0)),
        out_shape=jax.ShapeDtypeStruct((t_pad, bp, hp), jnp.float32),
        scratch_shapes=[pltpu.VMEM((bt, hp), jnp.float32)],
        compiler_params=pltpu.CompilerParams(
            dimension_semantics=("parallel", "arbitrary"),
            vmem_limit_bytes=_vmem_limit(hp, bt, chunk, w_dtype.itemsize)),
        cost_estimate=pl.CostEstimate(
            flops=2 * t_pad * bp * hp * hp,
            transcendentals=t_pad * bp * hp,
            bytes_accessed=hp * hp * w_dtype.itemsize + t_pad * bp * hp * 4 + bp * hp * 4),
    )

    def fn(state, wt):
        s0 = jnp.pad(state, ((0, bp - b), (0, hp - n_hid)))
        nxt = call(s0, wt)[:t_steps, :b, :n_hid]
        states = jnp.concatenate([state[None], nxt[:-1]], axis=0)
        exp = states[:, :, :n_obs]
        return exp, nxt

    return jax.jit(fn)


# ---------------------------------------------------------------------------
# Wrapper (JAX/Pallas equivalent of vanilla_cell)
# ---------------------------------------------------------------------------
class VanillaCellPallas:
    def __init__(self, n_obs, n_hid_vars, init_range=(-0.75, 0.75), key=None,
                 weight_dtype=jnp.float32, chunk=8):
        assert n_obs <= n_hid_vars, "vanilla_cell assumes n_obs <= n_hid_vars"
        self.n_obs = n_obs
        self.n_hid_vars = n_hid_vars
        self.chunk = int(chunk)
        self.hp = max(128, _round_up(n_hid_vars, 128))      # lane-aligned hidden width
        if key is None:
            key = jax.random.PRNGKey(0)
        # CustomLinear: weight (out, in), uniform(init_range), no bias.
        self.W = jax.random.uniform(key, (n_hid_vars, n_hid_vars),
                                    minval=init_range[0], maxval=init_range[1],
                                    dtype=jnp.float32)
        self.w_dtype = jnp.dtype(weight_dtype)
        wt = jnp.zeros((self.hp, self.hp), jnp.float32)
        wt = wt.at[:n_hid_vars, :n_hid_vars].set(self.W.T)   # row_x @ Wt == A(x)
        self.Wt = wt.astype(self.w_dtype)
        col = jnp.arange(self.hp)[None, :]
        self.tf_gain = jnp.where(col < n_obs, 2.0, 1.0).astype(jnp.float32)  # (1, Hp)

    # batch padding: sublane-aligned tiles, <=128 rows per tile (leading "parallel" axis)
    def _batch_dims(self, b):
        bp = _round_up(max(int(b), 1), 8)
        if bp > 128:
            bp = _round_up(bp, 128)
            bt = 128
        else:
            bt = bp
        return bp, bt

    def __call__(self, state, teacher_forcing, observation=None):
        """Single-step forward; returns (expectation (O,), next_state (H,), delta or None)."""
        O, H = self.n_obs, self.n_hid_vars
        s = jnp.asarray(state, jnp.float32).reshape(1, H)
        bp, bt = self._batch_dims(1)
        if teacher_forcing:
            if observation is None:
                raise ValueError("`observation` must be provided when `teacher_forcing` is True.")
            obs = jnp.asarray(observation, jnp.float32).reshape(1, 1, O)
            fn = _build_tf_rollout(O, H, self.hp, 1, bp, bt, 1, 1, self.w_dtype.name)
            exp, nxt, delta = fn(s, obs, self.Wt, self.tf_gain)
            return exp[0, 0], nxt[0, 0], delta[0, 0]
        fn = _build_free_rollout(O, H, self.hp, 1, bp, bt, 1, 1, self.w_dtype.name)
        exp, nxt = fn(s, self.Wt)
        return exp[0, 0], nxt[0, 0], None

    def forward_sequence(self, state, observations, chunk=None):
        """Fused teacher-forced rollout.  state (H,) or (B,H); observations (T,O) or (T,B,O).
        Returns (expectations, next_states, deltas) with matching leading dims."""
        O, H = self.n_obs, self.n_hid_vars
        state = jnp.asarray(state, jnp.float32)
        obs = jnp.asarray(observations, jnp.float32)
        squeeze = state.ndim == 1
        if squeeze:
            state = state[None]
        if obs.ndim == 2:
            obs = obs[:, None, :]
        b, t = state.shape[0], obs.shape[0]
        assert obs.shape[1] == b and obs.shape[2] == O
        c = max(1, min(chunk or self.chunk, t))
        bp, bt = self._batch_dims(b)
        fn = _build_tf_rollout(O, H, self.hp, b, bp, bt, t, c, self.w_dtype.name)
        exp, nxt, delta = fn(state, obs, self.Wt, self.tf_gain)
        if squeeze:
            exp, nxt, delta = exp[:, 0], nxt[:, 0], delta[:, 0]
        return exp, nxt, delta

    def free_run_sequence(self, state, n_steps, chunk=None):
        """Fused free-running rollout for n_steps (no teacher forcing)."""
        O, H = self.n_obs, self.n_hid_vars
        state = jnp.asarray(state, jnp.float32)
        squeeze = state.ndim == 1
        if squeeze:
            state = state[None]
        b = state.shape[0]
        c = max(1, min(chunk or self.chunk, int(n_steps)))
        bp, bt = self._batch_dims(b)
        fn = _build_free_rollout(O, H, self.hp, b, bp, bt, int(n_steps), c, self.w_dtype.name)
        exp, nxt = fn(state, self.Wt)
        if squeeze:
            exp, nxt = exp[:, 0], nxt[:, 0]
        return exp, nxt


# ---------------------------------------------------------------------------
# Pure-JAX reference (mirrors the PyTorch forward with explicit ConMat/Ide, f32 HIGHEST)
# ---------------------------------------------------------------------------
def _ref_forward(W, n_obs, n_hid, state, teacher_forcing, observation=None):
    ConMat = jnp.eye(n_obs, n_hid, dtype=jnp.float32)
    hi = lax.Precision.HIGHEST
    expectation = jnp.matmul(ConMat, state, precision=hi)
    if teacher_forcing:
        delta = observation - expectation
        teach = jnp.matmul(ConMat.T, delta, precision=hi)
        r_state = state - teach
        next_state = jnp.matmul(jnp.tanh(r_state), W.T, precision=hi)
        return expectation, next_state, delta
    r_state = jnp.matmul(jnp.eye(n_hid, dtype=jnp.float32), state, precision=hi)
    next_state = jnp.matmul(jnp.tanh(r_state), W.T, precision=hi)
    return expectation, next_state, None


if __name__ == "__main__":
    n_obs, n_hid, T = 16, 32, 8
    key = jax.random.PRNGKey(0)
    k_w, k_s, k_o = jax.random.split(key, 3)

    cell = VanillaCellPallas(n_obs, n_hid, key=k_w, chunk=4)   # chunk=4 -> 2 grid steps for T=8
    state = jax.random.normal(k_s, (n_hid,), dtype=jnp.float32)
    obs_seq = jax.random.normal(k_o, (T, n_obs), dtype=jnp.float32)

    # --- teacher forcing, single step, vs exact-f32 reference ---
    exp_, nxt, delta = cell(state, True, obs_seq[0])
    jax.block_until_ready((exp_, nxt, delta))
    e_r, n_r, d_r = _ref_forward(cell.W, n_obs, n_hid, state, True, obs_seq[0])
    assert exp_.shape == (n_obs,) and nxt.shape == (n_hid,) and delta.shape == (n_obs,)
    assert jnp.allclose(exp_, e_r, rtol=1e-5, atol=1e-5)
    assert jnp.allclose(delta, d_r, rtol=1e-5, atol=1e-5)
    # next_state tolerance covers MXU default (bf16-input) precision vs f32 HIGHEST reference.
    assert jnp.allclose(nxt, n_r, rtol=2e-2, atol=5e-2)

    # --- free running, single step ---
    exp_fr, nxt_fr, none_term = cell(state, False)
    jax.block_until_ready((exp_fr, nxt_fr))
    e_r, n_r, _ = _ref_forward(cell.W, n_obs, n_hid, state, False)
    assert none_term is None
    assert jnp.allclose(exp_fr, e_r, rtol=1e-5, atol=1e-5)
    assert jnp.allclose(nxt_fr, n_r, rtol=2e-2, atol=5e-2)

    # --- fused teacher-forced rollout vs per-step kernel (re-anchored each step) ---
    exps, nxts, deltas = cell.forward_sequence(state, obs_seq)
    jax.block_until_ready((exps, nxts, deltas))
    assert exps.shape == (T, n_obs) and nxts.shape == (T, n_hid) and deltas.shape == (T, n_obs)
    s = state
    for t in range(T):
        e_t, n_t, d_t = cell(s, True, obs_seq[t])
        assert jnp.allclose(exps[t], e_t, rtol=1e-5, atol=1e-5)
        assert jnp.allclose(deltas[t], d_t, rtol=1e-5, atol=1e-5)
        assert jnp.allclose(nxts[t], n_t, rtol=2e-2, atol=5e-2)
        s = nxts[t]          # re-anchor to the fused trajectory (no error compounding)

    # --- fused free-running rollout vs per-step kernel (re-anchored) ---
    exps_f, nxts_f = cell.free_run_sequence(state, T)
    jax.block_until_ready((exps_f, nxts_f))
    assert exps_f.shape == (T, n_obs) and nxts_f.shape == (T, n_hid)
    s = state
    for t in range(T):
        e_t, n_t, _ = cell(s, False)
        assert jnp.allclose(exps_f[t], e_t, rtol=1e-5, atol=1e-5)
        assert jnp.allclose(nxts_f[t], n_t, rtol=2e-2, atol=5e-2)
        s = nxts_f[t]

    print("KERNEL_OK")
</pallas_src>

<mosaic_0001>
module attributes {stable_mosaic.version = 11 : i64} {
  func.func @_tf_seq_kernel(%arg0: i32, %arg1: i32, %arg2: memref<8x128xf32, #tpu.memory_space<vmem>>, %arg3: memref<1x128xf32, #tpu.memory_space<vmem>>, %arg4: memref<128x128xf32, #tpu.memory_space<vmem>>, %arg5: memref<1x8x128xf32, #tpu.memory_space<vmem>>, %arg6: memref<1x8x128xf32, #tpu.memory_space<vmem>>, %arg7: memref<8x128xf32, #tpu.memory_space<vmem>>) attributes {dimension_semantics = [#tpu.dimension_semantics<parallel>, #tpu.dimension_semantics<arbitrary>], iteration_bounds = array<i64: 1, 1>, scalar_prefetch = 0 : i64, scratch_operands = 1 : i64, tpu.core_type = #tpu.core_type<tc>, window_params = [{transform_indices = @transform_0, window_bounds = array<i64: 8, 128>}, {pipeline_mode = #tpu.pipeline_mode<synchronous>, transform_indices = @transform_1, window_bounds = array<i64: 1, 128>}, {pipeline_mode = #tpu.pipeline_mode<synchronous>, transform_indices = @transform_2, window_bounds = array<i64: 128, 128>}, {transform_indices = @transform_3, window_bounds = array<i64: 1, 8, 128>}, {transform_indices = @transform_4, window_bounds = array<i64: 1, 8, 128>}]} {
    %c0_i32 = arith.constant 0 : i32
    %0 = arith.cmpi eq, %arg1, %c0_i32 : i32
    %1 = arith.extui %0 : i1 to i32
    %c0_i32_0 = arith.constant 0 : i32
    %2 = arith.cmpi ne, %1, %c0_i32_0 : i32
    scf.if %2 {
      %c0_13 = arith.constant 0 : index
      %c0_14 = arith.constant 0 : index
      %19 = vector.load %arg2[%c0_13, %c0_14] : memref<8x128xf32, #tpu.memory_space<vmem>>, vector<8x128xf32>
      %c0_15 = arith.constant 0 : index
      %c0_16 = arith.constant 0 : index
      %20 = vector.load %arg7[%c0_15, %c0_16] : memref<8x128xf32, #tpu.memory_space<vmem>>, vector<8x128xf32>
      tpu.vector_store %arg7[%c0_15, %c0_16], %19 {strides = array<i32>} : memref<8x128xf32, #tpu.memory_space<vmem>>, vector<8x128xf32>,
    } else {
    }
    %c0 = arith.constant 0 : index
    %c0_1 = arith.constant 0 : index
    %3 = vector.load %arg3[%c0, %c0_1] : memref<1x128xf32, #tpu.memory_space<vmem>>, vector<1x128xf32>
    %c0_2 = arith.constant 0 : index
    %c0_3 = arith.constant 0 : index
    %4 = vector.load %arg4[%c0_2, %c0_3] : memref<128x128xf32, #tpu.memory_space<vmem>>, vector<128x128xf32>
    %c0_4 = arith.constant 0 : index
    %c0_5 = arith.constant 0 : index
    %5 = vector.load %arg7[%c0_4, %c0_5] : memref<8x128xf32, #tpu.memory_space<vmem>>, vector<8x128xf32>
    %c0_i32_6 = arith.constant 0 : i32
    %6 = vector.broadcast %3 : vector<1x128xf32> to vector<8x128xf32>
    %7 = arith.mulf %6, %5 : vector<8x128xf32>
    %8 = arith.index_cast %c0_i32_6 : i32 to index
    %c0_7 = arith.constant 0 : index
    %c0_8 = arith.constant 0 : index
    %9 = vector.load %arg5[%8, %c0_7, %c0_8] : memref<1x8x128xf32, #tpu.memory_space<vmem>>, vector<1x8x128xf32>
    %10 = vector.shape_cast %9 : vector<1x8x128xf32> to vector<8x128xf32>
    %11 = arith.subf %7, %10 : vector<8x128xf32>
    %12 = math.tanh %11 : vector<8x128xf32>
    %cst = arith.constant dense<0.000000e+00> : vector<8x128xf32>
    %13 = tpu.matmul %12, %4, %cst {dimension_numbers = #tpu.dot_dimension_numbers<[1], [0], [0], [1], [0, 0, 1, 1], [], []>} : vector<8x128xf32>, vector<128x128xf32>, vector<8x128xf32> -> vector<8x128xf32>
    %14 = arith.index_cast %c0_i32_6 : i32 to index
    %c0_9 = arith.constant 0 : index
    %c0_10 = arith.constant 0 : index
    %15 = vector.load %arg6[%14, %c0_9, %c0_10] : memref<1x8x128xf32, #tpu.memory_space<vmem>>, vector<1x8x128xf32>
    %16 = vector.shape_cast %15 : vector<1x8x128xf32> to vector<8x128xf32>
    %17 = vector.shape_cast %13 : vector<8x128xf32> to vector<1x8x128xf32>
    tpu.vector_store %arg6[%14, %c0_9, %c0_10], %17 {strides = array<i32>} : memref<1x8x128xf32, #tpu.memory_space<vmem>>, vector<1x8x128xf32>,
    %c1_i32 = arith.constant 1 : i32
    %c0_11 = arith.constant 0 : index
    %c0_12 = arith.constant 0 : index
    %18 = vector.load %arg7[%c0_11, %c0_12] : memref<8x128xf32, #tpu.memory_space<vmem>>, vector<8x128xf32>
    tpu.vector_store %arg7[%c0_11, %c0_12], %13 {strides = array<i32>} : memref<8x128xf32, #tpu.memory_space<vmem>>, vector<8x128xf32>,
    return
  }
  func.func @transform_0(%arg0: i32, %arg1: i32) -> (i32, i32) {
    %c0_i32 = arith.constant 0 : i32
    %c0_i32_0 = arith.constant 0 : i32
    return %arg0, %c0_i32 : i32, i32
  }
  func.func @transform_1(%arg0: i32, %arg1: i32) -> (i32, i32) {
    %c0_i32 = arith.constant 0 : i32
    %c0_i32_0 = arith.constant 0 : i32
    %c0_i32_1 = arith.constant 0 : i32
    return %c0_i32, %c0_i32_0 : i32, i32
  }
  func.func @transform_2(%arg0: i32, %arg1: i32) -> (i32, i32) {
    %c0_i32 = arith.constant 0 : i32
    %c0_i32_0 = arith.constant 0 : i32
    %c0_i32_1 = arith.constant 0 : i32
    return %c0_i32, %c0_i32_0 : i32, i32
  }
  func.func @transform_3(%arg0: i32, %arg1: i32) -> (i32, i32, i32) {
    %c0_i32 = arith.constant 0 : i32
    %c0_i32_0 = arith.constant 0 : i32
    return %arg1, %arg0, %c0_i32 : i32, i32, i32
  }
  func.func @transform_4(%arg0: i32, %arg1: i32) -> (i32, i32, i32) {
    %c0_i32 = arith.constant 0 : i32
    %c0_i32_0 = arith.constant 0 : i32
    return %arg1, %arg0, %c0_i32 : i32, i32, i32
  }
}

</mosaic_0001>

<bundles_post_ra>
// kernel: fn.1
= control target key start
LH: loop header
LB: loop body
LE: loop exit
PB: predicated region body
PF: predicated region fallthrough
CT: control target
= control target key end

     0   :  { %9 = vsyncpa [#allocation4], 0  ;;  %s224_s15 = smov [#allocation3]   ;;  %s269_s0 = inlined_call_operand.vmem [shape: f32[8,128], index: 0, kind: input, shape index: {}]   ;;  %s270_s1 = inlined_call_operand.vmem [shape: f32[1,128], index: 1, kind: input, shape index: {}]   ;;  %s271_s2 = inlined_call_operand.hbm [shape: f32[128,128], index: 2, kind: input, shape index: {}]   ;;  %s272_s3 = inlined_call_operand.vmem [shape: f32[1,8,128], index: 3, kind: input, shape index: {}]   ;;  %s273_s4 = inlined_call_operand.vmem [shape: f32[1,8,128], index: 4, kind: output, shape index: {}]  }
   0x1   :  { %s19_s16 = sshll.u32 %s224_s15, 4  ;;  %s20_s16 = int_to_ptr.vmem [resolvable:$true] %s19_s16 }
   0x2   :  { %s210_s17 = scalar_lea.vmem %s20_s16, 2048  ;;  %p215_p1 = scmp.lt.s32.totalorder %s20_s16, %s20_s16 }
   0x3   :  { %p211_p0 = scmp.ne.s32.totalorder %s20_s16, %s210_s17  ;;  %p216_p2 = scmp.lt.s32.totalorder %s210_s17, %s210_s17 }
   0x5   :  { %p217_p3 = por %p216_p2, %p215_p1 }
   0x7   :  { %p218_p4 = pnand %p217_p3, %p211_p0 }
   0x9   :  { %221 = shalt.err (!%p218_p4)
}
   0xa   :  { %s225_s18 = smov 128   ;;  %s226_s19 = smov 8  }
   0xb   :  { %25 = dma.hbm_to_vmem [thread:$0]  %s271_s2, 2048, %s20_s16, [#allocation4], %s225_s18, %s225_s18, %s226_s19  }
   0xc   :  { %222 = dma.done.wait [#allocation4], 2048  }
   0xd   :  { %223 = vsyncadd [#allocation4], 4294965248  ;;  %v227_v0 = vmov 0.0   ;;  %vm228_vm0 = vmmov 0   ;;  %v53_v1 = vld [vmem:[#allocation3 + $0x78] sm:$0xff]  ;;  %v52_v2 = vld [vmem:[#allocation3 + $0x70] sm:$0xff] }
   0xe   :  { %160 = vmatprep.subr.mxu0 %v227_v0  ;;  %192 = vmatprep.mubr.msk.f32.mxu0 %vm228_vm0, %v227_v0  ;;  %v51_v3 = vld [vmem:[#allocation3 + $0x68] sm:$0xff]  ;;  %v50_v4 = vld [vmem:[#allocation3 + $0x60] sm:$0xff]  ;;  %v49_v7 = vld [vmem:[#allocation3 + $0x58] sm:$0xff] }
   0xf   :  { %161 = vmatpush3.msra.mxu0 %v53_v1  ;;  %v35_v5 = vld [vmem:[%s269_s0] sm:$0xff]  ;;  %v48_v8 = vld [vmem:[#allocation3 + $0x50] sm:$0xff]  ;;  %v47_v11 = vld [vmem:[#allocation3 + $0x48] sm:$0xff] }
  0x10   :  { %162 = vmatprep.subr.mxu0 %v227_v0  ;;  %v142_v6 = vld [vmem:[%s270_s1] ss:$0 sm:$0xff]  ;;  %v45_v14 = vld [vmem:[#allocation3 + $0x38] sm:$0xff]  ;;  %v44_v15 = vld [vmem:[#allocation3 + $0x30] sm:$0xff] }
  0x11   :  { %163 = vmatpush3.msra.mxu0 %v52_v2  ;;  %v61_v9 = vmul.f32 %v142_v6, %v35_v5  ;;  %v62_v10 = vld [vmem:[%s272_s3] sm:$0xff]  ;;  %v43_v16 = vld [vmem:[#allocation3 + $0x28] sm:$0xff]  ;;  %v41_v18 = vld [vmem:[#allocation3 + $0x18] sm:$0xff] }
  0x12   :  { %164 = vmatprep.subr.mxu0 %v227_v0  ;;  %v46_v12 = vld [vmem:[#allocation3 + $0x40] sm:$0xff]  ;;  %v40_v19 = vld [vmem:[#allocation3 + $0x10] sm:$0xff]  ;;  %v39_v20 = vld [vmem:[#allocation3 + $0x8] sm:$0xff] }
  0x13   :  { %165 = vmatpush3.msra.mxu0 %v51_v3  ;;  %v63_v13 = vsub.f32 %v61_v9, %v62_v10  ;;  %v42_v17 = vld [vmem:[#allocation3 + $0x20] sm:$0xff] }
  0x14   :  { %166 = vmatprep.subr.mxu0 %v227_v0  ;;  %v38_v21 = vld [vmem:[#allocation3] sm:$0xff] }
  0x15   :  { %167 = vmatpush3.msra.mxu0 %v50_v4  ;;  %200 = vtanh.f32 %v63_v13 }
  0x16   :  { %168 = vmatprep.subr.mxu0 %v227_v0 }
  0x17   :  { %169 = vmatpush3.msra.mxu0 %v49_v7 }
  0x18   :  { %170 = vmatprep.subr.mxu0 %v227_v0 }
  0x19   :  { %171 = vmatpush3.msra.mxu0 %v48_v8 }
  0x1a   :  { %172 = vmatprep.subr.mxu0 %v227_v0 }
  0x1b   :  { %173 = vmatpush3.msra.mxu0 %v47_v11 }
  0x1c   :  { %174 = vmatprep.subr.mxu0 %v227_v0 }
  0x1d   :  { %175 = vmatpush3.msra.mxu0 %v46_v12 }
  0x1e   :  { %176 = vmatprep.subr.mxu0 %v227_v0 }
  0x1f   :  { %177 = vmatpush3.msra.mxu0 %v45_v14 }
  0x20   :  { %178 = vmatprep.subr.mxu0 %v227_v0 }
  0x21   :  { %179 = vmatpush3.msra.mxu0 %v44_v15 }
  0x22   :  { %180 = vmatprep.subr.mxu0 %v227_v0  ;;  %v201_v22 = vpop.eup %200 }
  0x23   :  { %181 = vmatpush3.msra.mxu0 %v43_v16 }
  0x24   :  { %182 = vmatprep.subr.mxu0 %v227_v0 }
  0x25   :  { %183 = vmatpush3.msra.mxu0 %v42_v17 }
  0x26   :  { %184 = vmatprep.subr.mxu0 %v227_v0 }
  0x27   :  { %185 = vmatpush3.msra.mxu0 %v41_v18 }
  0x28   :  { %186 = vmatprep.subr.mxu0 %v227_v0 }
  0x29   :  { %187 = vmatpush3.msra.mxu0 %v40_v19 }
  0x2a   :  { %188 = vmatprep.subr.mxu0 %v227_v0 }
  0x2b   :  { %189 = vmatpush3.msra.mxu0 %v39_v20 }
  0x2c   :  { %190 = vmatprep.subr.mxu0 %v227_v0 }
  0x2d   :  { %191 = vmatpush3.msra.mxu0 %v38_v21 }
  0x2e   :  { %193 = vmatmul.mubr.f32.vlgmr.msra.gmra.mxu0 %v201_v22 }
  0xee   :  { %v131_v23 = vpop.f32.mrf.mxu0 }
  0xef   :  { %135 = vst [vmem:[%s273_s4] sm:$0xff] %v131_v23 }
  0xf0   :  { %v194_v24 = vpop.f32.mrf.mxu0 }
  0xf1   :  { %141 = vsyncpa [#allocation4], 1 }

</bundles_post_ra>
